<compile_context>
chip_gen: v5e
topology: v5e:2x2
jax: 0.10.0
libtpu: 0.0.40
codegen_flags: <defaults>
</compile_context>

<pallas_src>
import jax
import jax.numpy as jnp
import numpy as np
from jax.experimental import pallas as pl
from jax.experimental.pallas import tpu as pltpu


# ---------------------------------------------------------------------------
# Layout helpers (plain JAX glue)
# ---------------------------------------------------------------------------

_C_COLS = 512          # lane-dense slab width (multiple of 128)
_MAX_BR = 2048         # 2048 x 512 x 4B = 4 MiB / input tile
                       # -> 2 inputs x 2 buffers x 4 MiB = 16 MiB (fits scoped VMEM)


def _round_up(x, m):
    return ((x + m - 1) // m) * m


def _lane_dense_2d(x, cols=128):
    """Flatten x and reshape to (rows, cols), zero-padding the tail."""
    flat = x.reshape(-1)
    n = flat.shape[0]
    rows = -(-n // cols)
    pad = rows * cols - n
    if pad:
        flat = jnp.pad(flat, (0, pad))
    return flat.reshape(rows, cols), n


def _prep_recon_pair(a, b):
    """Flatten a/b to identically padded lane-dense (rows_p, _C_COLS) slabs."""
    af = a.reshape(-1)
    bf = b.reshape(-1)
    n = af.shape[0]
    rows = -(-n // _C_COLS)
    rows8 = _round_up(rows, 8)
    br = min(_MAX_BR, rows8)             # row tile (multiple of 8)
    rows_p = _round_up(rows8, br)        # grid-friendly padded row count
    pad = rows_p * _C_COLS - n
    if pad:
        af = jnp.pad(af, (0, pad))       # both padded with zeros -> |a-b| = 0
        bf = jnp.pad(bf, (0, pad))
    return (af.reshape(rows_p, _C_COLS), bf.reshape(rows_p, _C_COLS),
            n, br, rows_p // br)


# ---------------------------------------------------------------------------
# Single fused loss kernel
# ---------------------------------------------------------------------------

def fused_backward_losses_call(seq_gen, seq_orig, mu, logvar,
                               pred_gen_t, pred_orig_t,
                               pred_gen_s, pred_orig_s,
                               fmap_gen, fmap_orig):
    a2d, b2d, n_recon, br, grid = _prep_recon_pair(seq_gen, seq_orig)
    batch = mu.shape[0]
    n_f = len(fmap_gen)

    fmap_in = []
    fmap_counts = []
    for fg, fo in zip(fmap_gen, fmap_orig):
        fg2, nf = _lane_dense_2d(fg, 128)
        fo2, _ = _lane_dense_2d(fo, 128)
        fmap_in += [fg2, fo2]
        fmap_counts.append(nf)

    small_inputs = [mu, logvar, pred_gen_t, pred_orig_t,
                    pred_gen_s, pred_orig_s] + fmap_in
    n_in = 2 + len(small_inputs)
    n_out = 7

    def kernel(*refs):
        a_ref, b_ref = refs[0], refs[1]
        sm = refs[2:n_in]
        (recon_out, kl_out, dt_out, ds_out,
         gs_out, gt_out, fmap_out) = refs[n_in:n_in + n_out]
        acc_ref = refs[n_in + n_out]
        mu_ref, lv_ref, pgt_ref, pot_ref, pgs_ref, pos_ref = sm[:6]
        fmap_refs = sm[6:]

        step = pl.program_id(0)
        last = pl.num_programs(0) - 1

        @pl.when(step == 0)
        def _():
            acc_ref[...] = jnp.zeros_like(acc_ref)

            # --- tiny losses, computed once and hidden under recon DMA ---
            m = mu_ref[...].astype(jnp.float32)
            lv = lv_ref[...].astype(jnp.float32)
            kl = -0.5 * jnp.sum(1.0 + lv - m * m - jnp.exp(lv)) / np.float32(batch)
            kl_out[...] = jnp.full((1, 1), kl, jnp.float32)

            pgt = pgt_ref[...].astype(jnp.float32)
            pot = pot_ref[...].astype(jnp.float32)
            pgs = pgs_ref[...].astype(jnp.float32)
            pos = pos_ref[...].astype(jnp.float32)

            dt = 0.5 * (jnp.mean(jnp.maximum(1.0 - pot, 0.0))
                        + jnp.mean(jnp.maximum(1.0 + pgt, 0.0)))
            ds = 0.5 * (jnp.mean(jnp.maximum(1.0 - pos, 0.0))
                        + jnp.mean(jnp.maximum(1.0 + pgs, 0.0)))
            dt_out[...] = jnp.full((1, 1), dt, jnp.float32)
            ds_out[...] = jnp.full((1, 1), ds, jnp.float32)
            gs_out[...] = jnp.full((1, 1), -jnp.mean(pgs), jnp.float32)
            gt_out[...] = jnp.full((1, 1), -jnp.mean(pgt), jnp.float32)

            fsum = jnp.float32(0.0)
            for lvl in range(n_f):
                fg = fmap_refs[2 * lvl][...].astype(jnp.float32)
                fo = fmap_refs[2 * lvl + 1][...].astype(jnp.float32)
                # padded tail is zero in both -> contributes 0 to the sum
                fsum = fsum + jnp.sum(jnp.abs(fg - fo)) / np.float32(fmap_counts[lvl])
            fmap_out[...] = jnp.full((1, 1), fsum / np.float32(n_f), jnp.float32)

        # --- recon L1: elementwise accumulation into a vreg-shaped buffer ---
        d = jnp.abs(a_ref[...].astype(jnp.float32) - b_ref[...].astype(jnp.float32))
        acc_ref[...] += jnp.sum(d.reshape(br // 8, 8, _C_COLS), axis=0)

        @pl.when(step == last)
        def _():
            recon_out[...] = jnp.full(
                (1, 1), jnp.sum(acc_ref[...]) / np.float32(n_recon), jnp.float32)

    recon_spec_a = pl.BlockSpec((br, _C_COLS), lambda i: (i, 0))
    recon_spec_b = pl.BlockSpec((br, _C_COLS), lambda i: (i, 0))
    small_specs = [pl.BlockSpec(tuple(x.shape), lambda i: (0, 0))
                   for x in small_inputs]
    scalar_out_specs = tuple(pl.BlockSpec((1, 1), lambda i: (0, 0))
                             for _ in range(n_out))

    outs = pl.pallas_call(
        kernel,
        out_shape=tuple(jax.ShapeDtypeStruct((1, 1), jnp.float32)
                        for _ in range(n_out)),
        grid_spec=pltpu.PrefetchScalarGridSpec(
            num_scalar_prefetch=0,
            grid=(grid,),
            in_specs=[recon_spec_a, recon_spec_b] + small_specs,
            out_specs=scalar_out_specs,
            scratch_shapes=[pltpu.VMEM((8, _C_COLS), jnp.float32)]),
        compiler_params=pltpu.CompilerParams(
            # "arbitrary": scratch accumulator is shared across the whole axis.
            dimension_semantics=("arbitrary",),
            vmem_limit_bytes=32 * 1024 * 1024),
    )(a2d, b2d, *small_inputs)

    names = ("recon", "kl", "disc_t", "disc_s", "gen_s", "gen_t", "fmap")
    return {k: v[0, 0] for k, v in zip(names, outs)}


# ---------------------------------------------------------------------------
# Weighted combination matching Backward.forward
# ---------------------------------------------------------------------------

def backward_losses(seq_gen, seq_orig, mu, covar,
                    pred_gen_t, pred_orig_t, pred_gen_s, pred_orig_s,
                    fmap_gen_t, fmap_orig_t,
                    w_kl=1e-4, w_coup_t=1.0, w_fmap_t=1.0,
                    w_mse=1.0, w_percep=1.0):
    parts = fused_backward_losses_call(
        seq_gen, seq_orig, mu, covar,
        pred_gen_t, pred_orig_t, pred_gen_s, pred_orig_s,
        fmap_gen_t, fmap_orig_t)

    # TODO(synk): gradient_penalty needs autograd through disc_t -> not a kernel op.
    L_GP = jnp.float32(0.0)
    # TODO(synk): LPIPS is an external pretrained network; omitted (treated as 0).
    LPIPS_val = jnp.float32(0.0)

    L_temp = w_coup_t * parts["gen_t"] + w_fmap_t * parts["fmap"]
    Loss_VAE = (parts["gen_s"] + L_temp
                + w_percep * LPIPS_val + w_kl * parts["kl"]
                + w_mse * parts["recon"])

    return {
        "Loss_VAE": Loss_VAE, "Loss_L1": parts["recon"], "Loss_KL": parts["kl"],
        "Loss_GEN_S": parts["gen_s"], "Loss_GEN_T": parts["gen_t"],
        "Loss_Disc_T": parts["disc_t"], "Loss_Fmap_T": parts["fmap"],
        "Loss_Disc_S": parts["disc_s"], "L_GP": L_GP,
    }


# ---------------------------------------------------------------------------
# Main
# ---------------------------------------------------------------------------

if __name__ == "__main__":
    key = jax.random.PRNGKey(0)
    ks = jax.random.split(key, 10)

    # small shapes: batch=2, seq=8 (sequence_length 9 minus first frame),
    # channels=3, spatial=16, latent=128
    B, T, C, H, W, D = 2, 8, 3, 16, 16, 128

    seq_orig = jax.random.normal(ks[0], (B, T, C, H, W), jnp.float32)
    seq_gen = jax.random.normal(ks[1], (B, T, C, H, W), jnp.float32)
    mu = jax.random.normal(ks[2], (B, D), jnp.float32) * 0.1
    covar = jax.random.normal(ks[3], (B, D), jnp.float32) * 0.1   # logvar

    # synthetic discriminator logits / feature maps (networks not translated)
    pred_gen_t = jax.random.normal(ks[4], (B, 128), jnp.float32)
    pred_orig_t = jax.random.normal(ks[5], (B, 128), jnp.float32)
    pred_gen_s = jax.random.normal(ks[6], (20, 128), jnp.float32)
    pred_orig_s = jax.random.normal(ks[7], (20, 128), jnp.float32)
    fmap_gen_t = [jax.random.normal(ks[8], (B, 32, 8, 8), jnp.float32),
                  jax.random.normal(ks[8], (B, 64, 4, 4), jnp.float32)]
    fmap_orig_t = [jax.random.normal(ks[9], (B, 32, 8, 8), jnp.float32),
                   jax.random.normal(ks[9], (B, 64, 4, 4), jnp.float32)]

    losses = backward_losses(seq_gen, seq_orig, mu, covar,
                             pred_gen_t, pred_orig_t, pred_gen_s, pred_orig_s,
                             fmap_gen_t, fmap_orig_t)
    losses = jax.tree_util.tree_map(jax.block_until_ready, losses)

    # pure-JAX reference check of the kernel-computed pieces
    ref_recon = jnp.mean(jnp.abs(seq_gen - seq_orig))
    ref_kl = -0.5 * jnp.mean(jnp.sum(1 + covar - mu ** 2 - jnp.exp(covar), axis=1))
    ref_disc_t = 0.5 * (jnp.mean(jax.nn.relu(1.0 - pred_orig_t))
                        + jnp.mean(jax.nn.relu(1.0 + pred_gen_t)))
    ref_disc_s = 0.5 * (jnp.mean(jax.nn.relu(1.0 - pred_orig_s))
                        + jnp.mean(jax.nn.relu(1.0 + pred_gen_s)))
    ref_gen_s = -jnp.mean(pred_gen_s)
    ref_gen_t = -jnp.mean(pred_gen_t)
    ref_fmap = sum(jnp.mean(jnp.abs(a - b))
                   for a, b in zip(fmap_gen_t, fmap_orig_t)) / len(fmap_gen_t)

    np.testing.assert_allclose(np.asarray(losses["Loss_L1"]), np.asarray(ref_recon),
                               rtol=1e-5, atol=1e-5)
    np.testing.assert_allclose(np.asarray(losses["Loss_KL"]), np.asarray(ref_kl),
                               rtol=1e-5, atol=1e-5)
    np.testing.assert_allclose(np.asarray(losses["Loss_Disc_T"]), np.asarray(ref_disc_t),
                               rtol=1e-5, atol=1e-5)
    np.testing.assert_allclose(np.asarray(losses["Loss_Disc_S"]), np.asarray(ref_disc_s),
                               rtol=1e-5, atol=1e-5)
    np.testing.assert_allclose(np.asarray(losses["Loss_GEN_S"]), np.asarray(ref_gen_s),
                               rtol=1e-5, atol=1e-5)
    np.testing.assert_allclose(np.asarray(losses["Loss_GEN_T"]), np.asarray(ref_gen_t),
                               rtol=1e-5, atol=1e-5)
    np.testing.assert_allclose(np.asarray(losses["Loss_Fmap_T"]), np.asarray(ref_fmap),
                               rtol=1e-5, atol=1e-5)

    print("KERNEL_OK")
</pallas_src>

<mosaic_0001>
module attributes {stable_mosaic.version = 11 : i64} {
  func.func @kernel(%arg0: i32, %arg1: memref<24x512xf32, #tpu.memory_space<vmem>>, %arg2: memref<24x512xf32, #tpu.memory_space<vmem>>, %arg3: memref<2x128xf32, #tpu.memory_space<vmem>>, %arg4: memref<2x128xf32, #tpu.memory_space<vmem>>, %arg5: memref<2x128xf32, #tpu.memory_space<vmem>>, %arg6: memref<2x128xf32, #tpu.memory_space<vmem>>, %arg7: memref<20x128xf32, #tpu.memory_space<vmem>>, %arg8: memref<20x128xf32, #tpu.memory_space<vmem>>, %arg9: memref<32x128xf32, #tpu.memory_space<vmem>>, %arg10: memref<32x128xf32, #tpu.memory_space<vmem>>, %arg11: memref<16x128xf32, #tpu.memory_space<vmem>>, %arg12: memref<16x128xf32, #tpu.memory_space<vmem>>, %arg13: memref<1x1xf32, #tpu.memory_space<vmem>>, %arg14: memref<1x1xf32, #tpu.memory_space<vmem>>, %arg15: memref<1x1xf32, #tpu.memory_space<vmem>>, %arg16: memref<1x1xf32, #tpu.memory_space<vmem>>, %arg17: memref<1x1xf32, #tpu.memory_space<vmem>>, %arg18: memref<1x1xf32, #tpu.memory_space<vmem>>, %arg19: memref<1x1xf32, #tpu.memory_space<vmem>>, %arg20: memref<8x512xf32, #tpu.memory_space<vmem>>) attributes {dimension_semantics = [#tpu.dimension_semantics<arbitrary>], iteration_bounds = array<i64: 1>, scalar_prefetch = 0 : i64, scratch_operands = 1 : i64, tpu.core_type = #tpu.core_type<tc>, window_params = [{transform_indices = @transform_0, window_bounds = array<i64: 24, 512>}, {transform_indices = @transform_1, window_bounds = array<i64: 24, 512>}, {pipeline_mode = #tpu.pipeline_mode<synchronous>, transform_indices = @transform_2, window_bounds = array<i64: 2, 128>}, {pipeline_mode = #tpu.pipeline_mode<synchronous>, transform_indices = @transform_3, window_bounds = array<i64: 2, 128>}, {pipeline_mode = #tpu.pipeline_mode<synchronous>, transform_indices = @transform_4, window_bounds = array<i64: 2, 128>}, {pipeline_mode = #tpu.pipeline_mode<synchronous>, transform_indices = @transform_5, window_bounds = array<i64: 2, 128>}, {pipeline_mode = #tpu.pipeline_mode<synchronous>, transform_indices = @transform_6, window_bounds = array<i64: 20, 128>}, {pipeline_mode = #tpu.pipeline_mode<synchronous>, transform_indices = @transform_7, window_bounds = array<i64: 20, 128>}, {pipeline_mode = #tpu.pipeline_mode<synchronous>, transform_indices = @transform_8, window_bounds = array<i64: 32, 128>}, {pipeline_mode = #tpu.pipeline_mode<synchronous>, transform_indices = @transform_9, window_bounds = array<i64: 32, 128>}, {pipeline_mode = #tpu.pipeline_mode<synchronous>, transform_indices = @transform_10, window_bounds = array<i64: 16, 128>}, {pipeline_mode = #tpu.pipeline_mode<synchronous>, transform_indices = @transform_11, window_bounds = array<i64: 16, 128>}, {pipeline_mode = #tpu.pipeline_mode<synchronous>, transform_indices = @transform_12, window_bounds = array<i64: 1, 1>}, {pipeline_mode = #tpu.pipeline_mode<synchronous>, transform_indices = @transform_13, window_bounds = array<i64: 1, 1>}, {pipeline_mode = #tpu.pipeline_mode<synchronous>, transform_indices = @transform_14, window_bounds = array<i64: 1, 1>}, {pipeline_mode = #tpu.pipeline_mode<synchronous>, transform_indices = @transform_15, window_bounds = array<i64: 1, 1>}, {pipeline_mode = #tpu.pipeline_mode<synchronous>, transform_indices = @transform_16, window_bounds = array<i64: 1, 1>}, {pipeline_mode = #tpu.pipeline_mode<synchronous>, transform_indices = @transform_17, window_bounds = array<i64: 1, 1>}, {pipeline_mode = #tpu.pipeline_mode<synchronous>, transform_indices = @transform_18, window_bounds = array<i64: 1, 1>}]} {
    %c0_i32 = arith.constant 0 : i32
    %0 = arith.cmpi eq, %arg0, %c0_i32 : i32
    %1 = arith.extui %0 : i1 to i32
    %c0_i32_0 = arith.constant 0 : i32
    %2 = arith.cmpi ne, %1, %c0_i32_0 : i32
    scf.if %2 {
      %cst_10 = arith.constant 0.000000e+00 : f32
      %15 = vector.broadcast %cst_10 : f32 to vector<8x512xf32>
      %c0_11 = arith.constant 0 : index
      %c0_12 = arith.constant 0 : index
      %16 = vector.load %arg20[%c0_11, %c0_12] : memref<8x512xf32, #tpu.memory_space<vmem>>, vector<8x512xf32>
      tpu.vector_store %arg20[%c0_11, %c0_12], %15 {strides = array<i32>} : memref<8x512xf32, #tpu.memory_space<vmem>>, vector<8x512xf32>,
      %c0_13 = arith.constant 0 : index
      %c0_14 = arith.constant 0 : index
      %17 = vector.load %arg3[%c0_13, %c0_14] : memref<2x128xf32, #tpu.memory_space<vmem>>, vector<2x128xf32>
      %c0_15 = arith.constant 0 : index
      %c0_16 = arith.constant 0 : index
      %18 = vector.load %arg4[%c0_15, %c0_16] : memref<2x128xf32, #tpu.memory_space<vmem>>, vector<2x128xf32>
      %cst_17 = arith.constant 1.000000e+00 : f32
      %19 = vector.broadcast %cst_17 : f32 to vector<2x128xf32>
      %20 = arith.addf %19, %18 : vector<2x128xf32>
      %21 = arith.mulf %17, %17 : vector<2x128xf32>
      %22 = arith.subf %20, %21 : vector<2x128xf32>
      %23 = math.exp %18 : vector<2x128xf32>
      %24 = arith.subf %22, %23 : vector<2x128xf32>
      %25 = vector.shape_cast %24 : vector<2x128xf32> to vector<1x2x128xf32>
      %cst_18 = arith.constant dense<0.000000e+00> : vector<1xf32>
      %26 = vector.multi_reduction <add>, %25, %cst_18 [1, 2] : vector<1x2x128xf32> to vector<1xf32>
      %27 = vector.shape_cast %26 : vector<1xf32> to vector<1x1x1xf32>
      %28 = vector.extract %27[0, 0, 0] : f32 from vector<1x1x1xf32>
      %cst_19 = arith.constant -5.000000e-01 : f32
      %29 = arith.mulf %cst_19, %28 : f32
      %cst_20 = arith.constant 2.000000e+00 : f32
      %30 = arith.divf %29, %cst_20 : f32
      %31 = vector.broadcast %30 : f32 to vector<1x1xf32>
      %c0_21 = arith.constant 0 : index
      %c0_22 = arith.constant 0 : index
      %32 = vector.load %arg14[%c0_21, %c0_22] : memref<1x1xf32, #tpu.memory_space<vmem>>, vector<1x1xf32>
      tpu.vector_store %arg14[%c0_21, %c0_22], %31 {strides = array<i32>} : memref<1x1xf32, #tpu.memory_space<vmem>>, vector<1x1xf32>,
      %c0_23 = arith.constant 0 : index
      %c0_24 = arith.constant 0 : index
      %33 = vector.load %arg5[%c0_23, %c0_24] : memref<2x128xf32, #tpu.memory_space<vmem>>, vector<2x128xf32>
      %c0_25 = arith.constant 0 : index
      %c0_26 = arith.constant 0 : index
      %34 = vector.load %arg6[%c0_25, %c0_26] : memref<2x128xf32, #tpu.memory_space<vmem>>, vector<2x128xf32>
      %c0_27 = arith.constant 0 : index
      %c0_28 = arith.constant 0 : index
      %35 = vector.load %arg7[%c0_27, %c0_28] : memref<20x128xf32, #tpu.memory_space<vmem>>, vector<20x128xf32>
      %c0_29 = arith.constant 0 : index
      %c0_30 = arith.constant 0 : index
      %36 = vector.load %arg8[%c0_29, %c0_30] : memref<20x128xf32, #tpu.memory_space<vmem>>, vector<20x128xf32>
      %cst_31 = arith.constant 1.000000e+00 : f32
      %37 = vector.broadcast %cst_31 : f32 to vector<2x128xf32>
      %38 = arith.subf %37, %34 : vector<2x128xf32>
      %cst_32 = arith.constant 0.000000e+00 : f32
      %39 = vector.broadcast %cst_32 : f32 to vector<2x128xf32>
      %40 = arith.maximumf %38, %39 : vector<2x128xf32>
      %41 = vector.shape_cast %40 : vector<2x128xf32> to vector<1x2x128xf32>
      %cst_33 = arith.constant dense<0.000000e+00> : vector<1xf32>
      %42 = vector.multi_reduction <add>, %41, %cst_33 [1, 2] : vector<1x2x128xf32> to vector<1xf32>
      %43 = vector.shape_cast %42 : vector<1xf32> to vector<1x1x1xf32>
      %44 = vector.extract %43[0, 0, 0] : f32 from vector<1x1x1xf32>
      %cst_34 = arith.constant 2.560000e+02 : f32
      %45 = arith.divf %44, %cst_34 : f32
      %cst_35 = arith.constant 1.000000e+00 : f32
      %46 = vector.broadcast %cst_35 : f32 to vector<2x128xf32>
      %47 = arith.addf %46, %33 : vector<2x128xf32>
      %cst_36 = arith.constant 0.000000e+00 : f32
      %48 = vector.broadcast %cst_36 : f32 to vector<2x128xf32>
      %49 = arith.maximumf %47, %48 : vector<2x128xf32>
      %50 = vector.shape_cast %49 : vector<2x128xf32> to vector<1x2x128xf32>
      %cst_37 = arith.constant dense<0.000000e+00> : vector<1xf32>
      %51 = vector.multi_reduction <add>, %50, %cst_37 [1, 2] : vector<1x2x128xf32> to vector<1xf32>
      %52 = vector.shape_cast %51 : vector<1xf32> to vector<1x1x1xf32>
      %53 = vector.extract %52[0, 0, 0] : f32 from vector<1x1x1xf32>
      %cst_38 = arith.constant 2.560000e+02 : f32
      %54 = arith.divf %53, %cst_38 : f32
      %55 = arith.addf %45, %54 : f32
      %cst_39 = arith.constant 5.000000e-01 : f32
      %56 = arith.mulf %cst_39, %55 : f32
      %cst_40 = arith.constant 1.000000e+00 : f32
      %57 = vector.broadcast %cst_40 : f32 to vector<20x128xf32>
      %58 = arith.subf %57, %36 : vector<20x128xf32>
      %cst_41 = arith.constant 0.000000e+00 : f32
      %59 = vector.broadcast %cst_41 : f32 to vector<20x128xf32>
      %60 = arith.maximumf %58, %59 : vector<20x128xf32>
      %61 = vector.shape_cast %60 : vector<20x128xf32> to vector<1x20x128xf32>
      %cst_42 = arith.constant dense<0.000000e+00> : vector<1xf32>
      %62 = vector.multi_reduction <add>, %61, %cst_42 [1, 2] : vector<1x20x128xf32> to vector<1xf32>
      %63 = vector.shape_cast %62 : vector<1xf32> to vector<1x1x1xf32>
      %64 = vector.extract %63[0, 0, 0] : f32 from vector<1x1x1xf32>
      %cst_43 = arith.constant 2.560000e+03 : f32
      %65 = arith.divf %64, %cst_43 : f32
      %cst_44 = arith.constant 1.000000e+00 : f32
      %66 = vector.broadcast %cst_44 : f32 to vector<20x128xf32>
      %67 = arith.addf %66, %35 : vector<20x128xf32>
      %cst_45 = arith.constant 0.000000e+00 : f32
      %68 = vector.broadcast %cst_45 : f32 to vector<20x128xf32>
      %69 = arith.maximumf %67, %68 : vector<20x128xf32>
      %70 = vector.shape_cast %69 : vector<20x128xf32> to vector<1x20x128xf32>
      %cst_46 = arith.constant dense<0.000000e+00> : vector<1xf32>
      %71 = vector.multi_reduction <add>, %70, %cst_46 [1, 2] : vector<1x20x128xf32> to vector<1xf32>
      %72 = vector.shape_cast %71 : vector<1xf32> to vector<1x1x1xf32>
      %73 = vector.extract %72[0, 0, 0] : f32 from vector<1x1x1xf32>
      %cst_47 = arith.constant 2.560000e+03 : f32
      %74 = arith.divf %73, %cst_47 : f32
      %75 = arith.addf %65, %74 : f32
      %cst_48 = arith.constant 5.000000e-01 : f32
      %76 = arith.mulf %cst_48, %75 : f32
      %77 = vector.broadcast %56 : f32 to vector<1x1xf32>
      %c0_49 = arith.constant 0 : index
      %c0_50 = arith.constant 0 : index
      %78 = vector.load %arg15[%c0_49, %c0_50] : memref<1x1xf32, #tpu.memory_space<vmem>>, vector<1x1xf32>
      tpu.vector_store %arg15[%c0_49, %c0_50], %77 {strides = array<i32>} : memref<1x1xf32, #tpu.memory_space<vmem>>, vector<1x1xf32>,
      %79 = vector.broadcast %76 : f32 to vector<1x1xf32>
      %c0_51 = arith.constant 0 : index
      %c0_52 = arith.constant 0 : index
      %80 = vector.load %arg16[%c0_51, %c0_52] : memref<1x1xf32, #tpu.memory_space<vmem>>, vector<1x1xf32>
      tpu.vector_store %arg16[%c0_51, %c0_52], %79 {strides = array<i32>} : memref<1x1xf32, #tpu.memory_space<vmem>>, vector<1x1xf32>,
      %81 = vector.shape_cast %35 : vector<20x128xf32> to vector<1x20x128xf32>
      %cst_53 = arith.constant dense<0.000000e+00> : vector<1xf32>
      %82 = vector.multi_reduction <add>, %81, %cst_53 [1, 2] : vector<1x20x128xf32> to vector<1xf32>
      %83 = vector.shape_cast %82 : vector<1xf32> to vector<1x1x1xf32>
      %84 = vector.extract %83[0, 0, 0] : f32 from vector<1x1x1xf32>
      %cst_54 = arith.constant 2.560000e+03 : f32
      %85 = arith.divf %84, %cst_54 : f32
      %cst_55 = arith.constant 0.000000e+00 : f32
      %86 = arith.subf %cst_55, %85 : f32
      %87 = vector.broadcast %86 : f32 to vector<1x1xf32>
      %c0_56 = arith.constant 0 : index
      %c0_57 = arith.constant 0 : index
      %88 = vector.load %arg17[%c0_56, %c0_57] : memref<1x1xf32, #tpu.memory_space<vmem>>, vector<1x1xf32>
      tpu.vector_store %arg17[%c0_56, %c0_57], %87 {strides = array<i32>} : memref<1x1xf32, #tpu.memory_space<vmem>>, vector<1x1xf32>,
      %89 = vector.shape_cast %33 : vector<2x128xf32> to vector<1x2x128xf32>
      %cst_58 = arith.constant dense<0.000000e+00> : vector<1xf32>
      %90 = vector.multi_reduction <add>, %89, %cst_58 [1, 2] : vector<1x2x128xf32> to vector<1xf32>
      %91 = vector.shape_cast %90 : vector<1xf32> to vector<1x1x1xf32>
      %92 = vector.extract %91[0, 0, 0] : f32 from vector<1x1x1xf32>
      %cst_59 = arith.constant 2.560000e+02 : f32
      %93 = arith.divf %92, %cst_59 : f32
      %cst_60 = arith.constant 0.000000e+00 : f32
      %94 = arith.subf %cst_60, %93 : f32
      %95 = vector.broadcast %94 : f32 to vector<1x1xf32>
      %c0_61 = arith.constant 0 : index
      %c0_62 = arith.constant 0 : index
      %96 = vector.load %arg18[%c0_61, %c0_62] : memref<1x1xf32, #tpu.memory_space<vmem>>, vector<1x1xf32>
      tpu.vector_store %arg18[%c0_61, %c0_62], %95 {strides = array<i32>} : memref<1x1xf32, #tpu.memory_space<vmem>>, vector<1x1xf32>,
      %c0_63 = arith.constant 0 : index
      %c0_64 = arith.constant 0 : index
      %97 = vector.load %arg9[%c0_63, %c0_64] : memref<32x128xf32, #tpu.memory_space<vmem>>, vector<32x128xf32>
      %c0_65 = arith.constant 0 : index
      %c0_66 = arith.constant 0 : index
      %98 = vector.load %arg10[%c0_65, %c0_66] : memref<32x128xf32, #tpu.memory_space<vmem>>, vector<32x128xf32>
      %99 = arith.subf %97, %98 : vector<32x128xf32>
      %100 = math.absf %99 : vector<32x128xf32>
      %101 = vector.shape_cast %100 : vector<32x128xf32> to vector<1x32x128xf32>
      %cst_67 = arith.constant dense<0.000000e+00> : vector<1xf32>
      %102 = vector.multi_reduction <add>, %101, %cst_67 [1, 2] : vector<1x32x128xf32> to vector<1xf32>
      %103 = vector.shape_cast %102 : vector<1xf32> to vector<1x1x1xf32>
      %104 = vector.extract %103[0, 0, 0] : f32 from vector<1x1x1xf32>
      %cst_68 = arith.constant 4.096000e+03 : f32
      %105 = arith.divf %104, %cst_68 : f32
      %cst_69 = arith.constant 0.000000e+00 : f32
      %106 = arith.addf %cst_69, %105 : f32
      %c0_70 = arith.constant 0 : index
      %c0_71 = arith.constant 0 : index
      %107 = vector.load %arg11[%c0_70, %c0_71] : memref<16x128xf32, #tpu.memory_space<vmem>>, vector<16x128xf32>
      %c0_72 = arith.constant 0 : index
      %c0_73 = arith.constant 0 : index
      %108 = vector.load %arg12[%c0_72, %c0_73] : memref<16x128xf32, #tpu.memory_space<vmem>>, vector<16x128xf32>
      %109 = arith.subf %107, %108 : vector<16x128xf32>
      %110 = math.absf %109 : vector<16x128xf32>
      %111 = vector.shape_cast %110 : vector<16x128xf32> to vector<1x16x128xf32>
      %cst_74 = arith.constant dense<0.000000e+00> : vector<1xf32>
      %112 = vector.multi_reduction <add>, %111, %cst_74 [1, 2] : vector<1x16x128xf32> to vector<1xf32>
      %113 = vector.shape_cast %112 : vector<1xf32> to vector<1x1x1xf32>
      %114 = vector.extract %113[0, 0, 0] : f32 from vector<1x1x1xf32>
      %cst_75 = arith.constant 2.048000e+03 : f32
      %115 = arith.divf %114, %cst_75 : f32
      %116 = arith.addf %106, %115 : f32
      %cst_76 = arith.constant 2.000000e+00 : f32
      %117 = arith.divf %116, %cst_76 : f32
      %118 = vector.broadcast %117 : f32 to vector<1x1xf32>
      %c0_77 = arith.constant 0 : index
      %c0_78 = arith.constant 0 : index
      %119 = vector.load %arg19[%c0_77, %c0_78] : memref<1x1xf32, #tpu.memory_space<vmem>>, vector<1x1xf32>
      tpu.vector_store %arg19[%c0_77, %c0_78], %118 {strides = array<i32>} : memref<1x1xf32, #tpu.memory_space<vmem>>, vector<1x1xf32>,
    } else {
    }
    %c0 = arith.constant 0 : index
    %c0_1 = arith.constant 0 : index
    %3 = vector.load %arg1[%c0, %c0_1] : memref<24x512xf32, #tpu.memory_space<vmem>>, vector<24x512xf32>
    %c0_2 = arith.constant 0 : index
    %c0_3 = arith.constant 0 : index
    %4 = vector.load %arg2[%c0_2, %c0_3] : memref<24x512xf32, #tpu.memory_space<vmem>>, vector<24x512xf32>
    %5 = arith.subf %3, %4 : vector<24x512xf32>
    %6 = math.absf %5 : vector<24x512xf32>
    %c0_4 = arith.constant 0 : index
    %c0_5 = arith.constant 0 : index
    %7 = vector.load %arg20[%c0_4, %c0_5] : memref<8x512xf32, #tpu.memory_space<vmem>>, vector<8x512xf32>
    %8 = vector.shape_cast %6 : vector<24x512xf32> to vector<3x8x512xf32>
    %cst = arith.constant dense<0.000000e+00> : vector<8x512xf32>
    %9 = vector.multi_reduction <add>, %8, %cst [0] : vector<3x8x512xf32> to vector<8x512xf32>
    %10 = arith.addf %7, %9 : vector<8x512xf32>
    %c0_6 = arith.constant 0 : index
    %c0_7 = arith.constant 0 : index
    %11 = vector.load %arg20[%c0_6, %c0_7] : memref<8x512xf32, #tpu.memory_space<vmem>>, vector<8x512xf32>
    tpu.vector_store %arg20[%c0_6, %c0_7], %10 {strides = array<i32>} : memref<8x512xf32, #tpu.memory_space<vmem>>, vector<8x512xf32>,
    %c0_i32_8 = arith.constant 0 : i32
    %12 = arith.cmpi eq, %arg0, %c0_i32_8 : i32
    %13 = arith.extui %12 : i1 to i32
    %c0_i32_9 = arith.constant 0 : i32
    %14 = arith.cmpi ne, %13, %c0_i32_9 : i32
    scf.if %14 {
      %c0_10 = arith.constant 0 : index
      %c0_11 = arith.constant 0 : index
      %15 = vector.load %arg20[%c0_10, %c0_11] : memref<8x512xf32, #tpu.memory_space<vmem>>, vector<8x512xf32>
      %16 = vector.shape_cast %15 : vector<8x512xf32> to vector<1x8x512xf32>
      %cst_12 = arith.constant dense<0.000000e+00> : vector<1xf32>
      %17 = vector.multi_reduction <add>, %16, %cst_12 [1, 2] : vector<1x8x512xf32> to vector<1xf32>
      %18 = vector.shape_cast %17 : vector<1xf32> to vector<1x1x1xf32>
      %19 = vector.extract %18[0, 0, 0] : f32 from vector<1x1x1xf32>
      %cst_13 = arith.constant 1.228800e+04 : f32
      %20 = arith.divf %19, %cst_13 : f32
      %21 = vector.broadcast %20 : f32 to vector<1x1xf32>
      %c0_14 = arith.constant 0 : index
      %c0_15 = arith.constant 0 : index
      %22 = vector.load %arg13[%c0_14, %c0_15] : memref<1x1xf32, #tpu.memory_space<vmem>>, vector<1x1xf32>
      tpu.vector_store %arg13[%c0_14, %c0_15], %21 {strides = array<i32>} : memref<1x1xf32, #tpu.memory_space<vmem>>, vector<1x1xf32>,
    } else {
    }
    return
  }
  func.func @transform_0(%arg0: i32) -> (i32, i32) {
    %c0_i32 = arith.constant 0 : i32
    %c0_i32_0 = arith.constant 0 : i32
    return %arg0, %c0_i32 : i32, i32
  }
  func.func @transform_1(%arg0: i32) -> (i32, i32) {
    %c0_i32 = arith.constant 0 : i32
    %c0_i32_0 = arith.constant 0 : i32
    return %arg0, %c0_i32 : i32, i32
  }
  func.func @transform_2(%arg0: i32) -> (i32, i32) {
    %c0_i32 = arith.constant 0 : i32
    %c0_i32_0 = arith.constant 0 : i32
    %c0_i32_1 = arith.constant 0 : i32
    return %c0_i32, %c0_i32_0 : i32, i32
  }
  func.func @transform_3(%arg0: i32) -> (i32, i32) {
    %c0_i32 = arith.constant 0 : i32
    %c0_i32_0 = arith.constant 0 : i32
    %c0_i32_1 = arith.constant 0 : i32
    return %c0_i32, %c0_i32_0 : i32, i32
  }
  func.func @transform_4(%arg0: i32) -> (i32, i32) {
    %c0_i32 = arith.constant 0 : i32
    %c0_i32_0 = arith.constant 0 : i32
    %c0_i32_1 = arith.constant 0 : i32
    return %c0_i32, %c0_i32_0 : i32, i32
  }
  func.func @transform_5(%arg0: i32) -> (i32, i32) {
    %c0_i32 = arith.constant 0 : i32
    %c0_i32_0 = arith.constant 0 : i32
    %c0_i32_1 = arith.constant 0 : i32
    return %c0_i32, %c0_i32_0 : i32, i32
  }
  func.func @transform_6(%arg0: i32) -> (i32, i32) {
    %c0_i32 = arith.constant 0 : i32
    %c0_i32_0 = arith.constant 0 : i32
    %c0_i32_1 = arith.constant 0 : i32
    return %c0_i32, %c0_i32_0 : i32, i32
  }
  func.func @transform_7(%arg0: i32) -> (i32, i32) {
    %c0_i32 = arith.constant 0 : i32
    %c0_i32_0 = arith.constant 0 : i32
    %c0_i32_1 = arith.constant 0 : i32
    return %c0_i32, %c0_i32_0 : i32, i32
  }
  func.func @transform_8(%arg0: i32) -> (i32, i32) {
    %c0_i32 = arith.constant 0 : i32
    %c0_i32_0 = arith.constant 0 : i32
    %c0_i32_1 = arith.constant 0 : i32
    return %c0_i32, %c0_i32_0 : i32, i32
  }
  func.func @transform_9(%arg0: i32) -> (i32, i32) {
    %c0_i32 = arith.constant 0 : i32
    %c0_i32_0 = arith.constant 0 : i32
    %c0_i32_1 = arith.constant 0 : i32
    return %c0_i32, %c0_i32_0 : i32, i32
  }
  func.func @transform_10(%arg0: i32) -> (i32, i32) {
    %c0_i32 = arith.constant 0 : i32
    %c0_i32_0 = arith.constant 0 : i32
    %c0_i32_1 = arith.constant 0 : i32
    return %c0_i32, %c0_i32_0 : i32, i32
  }
  func.func @transform_11(%arg0: i32) -> (i32, i32) {
    %c0_i32 = arith.constant 0 : i32
    %c0_i32_0 = arith.constant 0 : i32
    %c0_i32_1 = arith.constant 0 : i32
    return %c0_i32, %c0_i32_0 : i32, i32
  }
  func.func @transform_12(%arg0: i32) -> (i32, i32) {
    %c0_i32 = arith.constant 0 : i32
    %c0_i32_0 = arith.constant 0 : i32
    %c0_i32_1 = arith.constant 0 : i32
    return %c0_i32, %c0_i32_0 : i32, i32
  }
  func.func @transform_13(%arg0: i32) -> (i32, i32) {
    %c0_i32 = arith.constant 0 : i32
    %c0_i32_0 = arith.constant 0 : i32
    %c0_i32_1 = arith.constant 0 : i32
    return %c0_i32, %c0_i32_0 : i32, i32
  }
  func.func @transform_14(%arg0: i32) -> (i32, i32) {
    %c0_i32 = arith.constant 0 : i32
    %c0_i32_0 = arith.constant 0 : i32
    %c0_i32_1 = arith.constant 0 : i32
    return %c0_i32, %c0_i32_0 : i32, i32
  }
  func.func @transform_15(%arg0: i32) -> (i32, i32) {
    %c0_i32 = arith.constant 0 : i32
    %c0_i32_0 = arith.constant 0 : i32
    %c0_i32_1 = arith.constant 0 : i32
    return %c0_i32, %c0_i32_0 : i32, i32
  }
  func.func @transform_16(%arg0: i32) -> (i32, i32) {
    %c0_i32 = arith.constant 0 : i32
    %c0_i32_0 = arith.constant 0 : i32
    %c0_i32_1 = arith.constant 0 : i32
    return %c0_i32, %c0_i32_0 : i32, i32
  }
  func.func @transform_17(%arg0: i32) -> (i32, i32) {
    %c0_i32 = arith.constant 0 : i32
    %c0_i32_0 = arith.constant 0 : i32
    %c0_i32_1 = arith.constant 0 : i32
    return %c0_i32, %c0_i32_0 : i32, i32
  }
  func.func @transform_18(%arg0: i32) -> (i32, i32) {
    %c0_i32 = arith.constant 0 : i32
    %c0_i32_0 = arith.constant 0 : i32
    %c0_i32_1 = arith.constant 0 : i32
    return %c0_i32, %c0_i32_0 : i32, i32
  }
}

</mosaic_0001>

<bundles_post_ra>
// kernel: tpu_custom_call.1
= control target key start
LH: loop header
LB: loop body
LE: loop exit
PB: predicated region body
PF: predicated region fallthrough
CT: control target
= control target key end

     0   :  { %s1506_s0 = inlined_call_operand.hbm [shape: f32[24,512], index: 0, kind: input, shape index: {}]   ;;  %s1507_s1 = inlined_call_operand.hbm [shape: f32[24,512], index: 1, kind: input, shape index: {}]   ;;  %s1508_s2 = inlined_call_operand.hbm [shape: f32[2,128], index: 2, kind: input, shape index: {}]   ;;  %s1509_s3 = inlined_call_operand.vmem [shape: f32[2,128], index: 3, kind: input, shape index: {}]   ;;  %s1510_s4 = inlined_call_operand.hbm [shape: f32[2,128], index: 4, kind: input, shape index: {}]   ;;  %s1511_s5 = inlined_call_operand.vmem [shape: f32[2,128], index: 5, kind: input, shape index: {}]   ;;  %s1512_s6 = inlined_call_operand.hbm [shape: f32[20,128], index: 6, kind: input, shape index: {}]   ;;  %s1513_s7 = inlined_call_operand.hbm [shape: f32[20,128], index: 7, kind: input, shape index: {}]   ;;  %s1514_s8 = inlined_call_operand.hbm [shape: f32[32,128], index: 8, kind: input, shape index: {}]   ;;  %s1515_s9 = inlined_call_operand.hbm [shape: f32[32,128], index: 9, kind: input, shape index: {}]   ;;  %s1516_s10 = inlined_call_operand.hbm [shape: f32[16,128], index: 10, kind: input, shape index: {}]   ;;  %s1517_s11 = inlined_call_operand.hbm [shape: f32[16,128], index: 11, kind: input, shape index: {}]   ;;  %s1518_s12 = inlined_call_operand.hbm [shape: f32[1,1], index: 12, kind: output, shape index: {0}]   ;;  %s1519_s13 = inlined_call_operand.hbm [shape: f32[1,1], index: 13, kind: output, shape index: {1}]   ;;  %s1520_s14 = inlined_call_operand.hbm [shape: f32[1,1], index: 14, kind: output, shape index: {2}]   ;;  %s1521_s15 = inlined_call_operand.hbm [shape: f32[1,1], index: 15, kind: output, shape index: {3}]   ;;  %s1522_s16 = inlined_call_operand.hbm [shape: f32[1,1], index: 16, kind: output, shape index: {4}]   ;;  %s1523_s17 = inlined_call_operand.hbm [shape: f32[1,1], index: 17, kind: output, shape index: {5}]   ;;  %s1524_s18 = inlined_call_operand.hbm [shape: f32[1,1], index: 18, kind: output, shape index: {6}]  }
   0x1   :  { %1530 = sst [smem:[#allocation44_spill]] %s1506_s0 }
   0x2   :  { %1531 = sst [smem:[#allocation45_spill]] %s1507_s1 }
   0x3   :  { %1532 = sst [smem:[#allocation46_spill]] %s1508_s2 }
   0x4   :  { %1533 = sst [smem:[#allocation47_spill]] %s1524_s18 }
   0x5   :  { %24 = vsyncpa [#allocation4], 0 }
   0x6   :  { %25 = vsyncpa [#allocation7], 0 }
   0x7   :  { %26 = vsyncpa [#allocation10], 0 }
   0x8   :  { %27 = vsyncpa [#allocation13], 0 }
   0x9   :  { %28 = vsyncpa [#allocation16], 0 }
   0xa   :  { %29 = vsyncpa [#allocation19], 0 }
   0xb   :  { %30 = vsyncpa [#allocation5], 0 }
   0xc   :  { %31 = vsyncpa [#allocation22], 0 }
   0xd   :  { %32 = vsyncpa [#allocation25], 0 }
   0xe   :  { %33 = vsyncpa [#allocation28], 0  ;;  %s1534_s29 = sld [smem:[#allocation45_spill]]  ;;  %s1195_s0 = smov [#allocation6]  }
   0xf   :  { %s53_s19 = sshll.u32 %s1195_s0, 4  ;;  %s78_s21 = sshll.u32 %s1510_s4, 4  ;;  %s54_s19 = int_to_ptr.vmem [resolvable:$true] %s53_s19  ;;  %s79_s21 = int_to_ptr.hbm [resolvable:$true] %s78_s21 }
  0x10   :  { %s1196_s22 = smov 512   ;;  %s1197_s2 = smov 32  }
  0x11   :  { %s1198_s23 = smov [#allocation9]   ;;  %s103_s27 = sshll.u32 %s1513_s7, 4  ;;  %s104_s27 = int_to_ptr.hbm [resolvable:$true] %s103_s27 }
  0x12   :  { %s80_s24 = sshll.u32 %s1198_s23, 4  ;;  %s1199_s28 = smov [#allocation12]   ;;  %s81_s24 = int_to_ptr.vmem [resolvable:$true] %s80_s24 }
  0x13   :  { %83 = dma.hbm_to_vmem [thread:$0]  %s79_s21, 32, %s81_s24, [#allocation10]  }
  0x14   :  { %s51_s30 = sshll.u32 %s1534_s29, 4  ;;  %s105_s29 = sshll.u32 %s1199_s28, 4  ;;  %s52_s30 = int_to_ptr.hbm [resolvable:$true] %s51_s30  ;;  %s106_s29 = int_to_ptr.vmem [resolvable:$true] %s105_s29 }
  0x15   :  { %59 = dma.hbm_to_vmem [thread:$0]  %s52_s30, 1536, %s54_s19, [#allocation7], %s1196_s22, %s1196_s22, %s1197_s2  }
  0x16   :  { %s129_s1 = sshll.u32 %s1515_s9, 4  ;;  %s1200_s20 = smov 128   ;;  %s130_s1 = int_to_ptr.hbm [resolvable:$true] %s129_s1 }
  0x17   :  { %s1201_s18 = smov 8   ;;  %s1202_s30 = smov [#allocation15]  }
  0x18   :  { %111 = dma.hbm_to_vmem [thread:$0]  %s104_s27, 384, %s106_s29, [#allocation13], %s1200_s20, %s1200_s20, %s1201_s18  }
  0x19   :  { %s131_s19 = sshll.u32 %s1202_s30, 4  ;;  %s1535_s7 = sld [smem:[#allocation44_spill]]  ;;  %s132_s19 = int_to_ptr.vmem [resolvable:$true] %s131_s19 }
  0x1a   :  { %137 = dma.hbm_to_vmem [thread:$0]  %s130_s1, 512, %s132_s19, [#allocation16], %s1200_s20, %s1200_s20, %s1201_s18  }
  0x1b   :  { %s1536_s26 = sld [smem:[#allocation46_spill]]  ;;  %s1203_s4 = smov [#allocation3]  }
  0x1c   :  { %s40_s0 = sshll.u32 %s1203_s4, 4  ;;  %s1204_s27 = smov [#allocation8]   ;;  %s41_s0 = int_to_ptr.vmem [resolvable:$true] %s40_s0 }
  0x1d   :  { %s67_s29 = sshll.u32 %s1204_s27, 4  ;;  %s90_s23 = sshll.u32 %s1512_s6, 4  ;;  %s68_s29 = int_to_ptr.vmem [resolvable:$true] %s67_s29  ;;  %s91_s23 = int_to_ptr.hbm [resolvable:$true] %s90_s23 }
  0x1e   :  { %s1205_s9 = smov [#allocation11]   ;;  %s142_s6 = sshll.u32 %s1516_s10, 4  ;;  %s143_s6 = int_to_ptr.hbm [resolvable:$true] %s142_s6 }
  0x1f   :  { %s38_s24 = sshll.u32 %s1535_s7, 4  ;;  %s116_s7 = sshll.u32 %s1514_s8, 4  ;;  %s39_s24 = int_to_ptr.hbm [resolvable:$true] %s38_s24  ;;  %s117_s7 = int_to_ptr.hbm [resolvable:$true] %s116_s7 }
  0x20   :  { %46 = dma.hbm_to_vmem [thread:$0]  %s39_s24, 1536, %s41_s0, [#allocation4], %s1196_s22, %s1196_s22, %s1197_s2  }
  0x21   :  { %s65_s28 = sshll.u32 %s1536_s26, 4  ;;  %s92_s25 = sshll.u32 %s1205_s9, 4  ;;  %s66_s28 = int_to_ptr.hbm [resolvable:$true] %s65_s28  ;;  %s93_s25 = int_to_ptr.vmem [resolvable:$true] %s92_s25 }
  0x22   :  { %70 = dma.hbm_to_vmem [thread:$0]  %s66_s28, 32, %s68_s29, [#allocation7]  }
  0x23   :  { %98 = dma.hbm_to_vmem [thread:$0]  %s91_s23, 384, %s93_s25, [#allocation10], %s1200_s20, %s1200_s20, %s1201_s18  }
  0x24   :  { %s1206_s22 = smov [#allocation14]   ;;  %s155_s4 = sshll.u32 %s1517_s11, 4  ;;  %s156_s4 = int_to_ptr.hbm [resolvable:$true] %s155_s4 }
  0x25   :  { %s118_s2 = sshll.u32 %s1206_s22, 4  ;;  %s1207_s0 = smov [#allocation17]   ;;  %s119_s2 = int_to_ptr.vmem [resolvable:$true] %s118_s2 }
  0x26   :  { %124 = dma.hbm_to_vmem [thread:$0]  %s117_s7, 512, %s119_s2, [#allocation13], %s1200_s20, %s1200_s20, %s1201_s18  }
  0x27   :  { %s144_s27 = sshll.u32 %s1207_s0, 4  ;;  %s1208_s29 = smov [#allocation18]   ;;  %s145_s27 = int_to_ptr.vmem [resolvable:$true] %s144_s27 }
  0x28   :  { %150 = dma.hbm_to_vmem [thread:$0]  %s143_s6, 256, %s145_s27, [#allocation16], %s1200_s20, %s1200_s20, %s1201_s18  }
  0x29   :  { %s157_s10 = sshll.u32 %s1208_s29, 4  ;;  %s158_s10 = int_to_ptr.vmem [resolvable:$true] %s157_s10 }
  0x2a   :  { %163 = dma.hbm_to_vmem [thread:$0]  %s156_s4, 256, %s158_s10, [#allocation19], %s1200_s20, %s1200_s20, %s1201_s18  }
  0x2b   :  { %1175 = dma.done.wait [#allocation4], 1536  }
  0x2c   :  { %1176 = vsyncadd [#allocation4], 4294965760 }
  0x2d   :  { %1177 = dma.done.wait [#allocation7], 1568  }
  0x2e   :  { %1178 = vsyncadd [#allocation7], 4294965728 }
  0x2f   :  { %1179 = dma.done.wait [#allocation10], 416  }
  0x30   :  { %1180 = vsyncadd [#allocation10], 4294966880 }
  0x31   :  { %1181 = dma.done.wait [#allocation13], 896  }
  0x32   :  { %1182 = vsyncadd [#allocation13], 4294966400 }
  0x33   :  { %1183 = dma.done.wait [#allocation16], 768  }
  0x34   :  { %1184 = vsyncadd [#allocation16], 4294966528 }
  0x35   :  { %1185 = dma.done.wait [#allocation19], 256  }
  0x36   :  { %1186 = vsyncadd [#allocation19], 4294967040  ;;  %vm303_vm0 = vcmask 1043456   ;;  %v246_v0 = vld [vmem:[#allocation11] sm:$0xff]  ;;  %v247_v1 = vld [vmem:[#allocation11 + $0x8] sm:$0xff]  ;;  %vm220_vm1 = vcmask 1041408  }
  0x37   :  { %v248_v2 = vld [vmem:[#allocation11 + $0x10] sm:$0xf]  ;;  %v325_v3 = vadd.f32 1.0, %v247_v1  ;;  %v357_v5 = vadd.f32 %v247_v1, %v246_v0  ;;  %v245_v7 = vld [vmem:[%s1511_s5] sm:$0x3]  ;;  %v324_v9 = vadd.f32 1.0, %v246_v0 }
  0x38   :  { %v326_v4 = vadd.f32 1.0, %v248_v2  ;;  %v358_v6 = vsel %vm303_vm0, %v248_v2, 0.0  ;;  %v249_v8 = vld [vmem:[#allocation12] sm:$0xff]  ;;  %v252_v10 = vsub.f32 1.0, %v245_v7  ;;  %v250_v12 = vld [vmem:[#allocation12 + $0x8] sm:$0xff]  ;;  %v441_v19 = vld [vmem:[#allocation17] sm:$0xff] }
  0x39   :  { %v244_v11 = vld [vmem:[#allocation9] sm:$0x3]  ;;  %v296_v13 = vsub.f32 1.0, %v249_v8  ;;  %v328_v14 = vmax.f32 %v325_v3, 0.0  ;;  %v359_v16 = vadd.f32 %v358_v6, %v357_v5  ;;  %v251_v18 = vld [vmem:[#allocation12 + $0x10] sm:$0xf] }
  0x3a   :  { %v329_v15 = vmax.f32 %v326_v4, 0.0  ;;  %v273_v17 = vadd.f32 1.0, %v244_v11  ;;  %v327_v20 = vmax.f32 %v324_v9, 0.0  ;;  %v253_v21 = vmax.f32 %v252_v10, 0.0  ;;  %v442_v23 = vld [vmem:[#allocation17 + $0x8] sm:$0xff]  ;;  %v443_v24 = vld [vmem:[#allocation18] sm:$0xff] }
  0x3b   :  { %v297_v22 = vsub.f32 1.0, %v250_v12  ;;  %360 = vadd.xlane.f32.xlu2 %v359_v16  ;;  %v298_v27 = vsub.f32 1.0, %v251_v18  ;;  %v299_v28 = vmax.f32 %v296_v13, 0.0  ;;  %v444_v29 = vld [vmem:[#allocation18 + $0x8] sm:$0xff]  ;;  %v403_v30 = vld [vmem:[#allocation14] sm:$0xff]  ;;  %v445_v34 = vsub.f32 %v441_v19, %v443_v24  ;;  %v404_v35 = vld [vmem:[#allocation14 + $0x8] sm:$0xff] }
  0x3c   :  { %v274_v25 = vmax.f32 %v273_v17, 0.0  ;;  %v331_v26 = vsel %vm303_vm0, %v329_v15, 0.0  ;;  %v254_v31 = vsel %vm220_vm1, %v253_v21, 0.0  ;;  %v330_v32 = vadd.f32 %v328_v14, %v327_v20  ;;  %v405_v36 = vld [vmem:[#allocation14 + $0x10] sm:$0xff]  ;;  %v407_v40 = vld [vmem:[#allocation15] sm:$0xff]  ;;  %v408_v41 = vld [vmem:[#allocation15 + $0x8] sm:$0xff] }
  0x3d   :  { %v300_v33 = vmax.f32 %v297_v22, 0.0  ;;  %255 = vadd.xlane.f32.xlu0 %v254_v31  ;;  %v301_v38 = vmax.f32 %v298_v27, 0.0  ;;  %v446_v39 = vsub.f32 %v442_v23, %v444_v29  ;;  %v409_v42 = vld [vmem:[#allocation15 + $0x10] sm:$0xff]  ;;  %v447_v44 = vand.u32 2147483647, %v445_v34  ;;  %v406_v45 = vld [vmem:[#allocation14 + $0x18] sm:$0xff] }
  0x3e   :  { %v275_v37 = vsel %vm220_vm1, %v274_v25, 0.0  ;;  %v410_v46 = vld [vmem:[#allocation15 + $0x18] sm:$0xff]  ;;  %v411_v47 = vsub.f32 %v403_v30, %v407_v40  ;;  %v332_v48 = vadd.f32 %v331_v26, %v330_v32  ;;  %v412_v50 = vsub.f32 %v404_v35, %v408_v41  ;;  %v212_v52 = vld [vmem:[#allocation8] sm:$0x3]  ;;  %v483_v62 = vld [vmem:[#allocation3 + $0x18] sm:$0xff]  ;;  %s597_s21 = sshll.u32 %s1519_s13, 4  ;;  %s1427_s21 = int_to_ptr.hbm [resolvable:$true] %s597_s21 }
  0x3f   :  { %276 = vadd.xlane.f32.xlu1 %v275_v37  ;;  %v302_v43 = vadd.f32 %v300_v33, %v299_v28  ;;  %v304_v49 = vsel %vm303_vm0, %v301_v38, 0.0  ;;  %v413_v51 = vsub.f32 %v405_v36, %v409_v42  ;;  %v213_v53 = vld [vmem:[%s1509_s3] sm:$0x3]  ;;  %v448_v54 = vand.u32 2147483647, %v446_v39  ;;  %v481_v57 = vld [vmem:[#allocation3 + $0x8] sm:$0xff] }
  0x40   :  { %v415_v55 = vand.u32 2147483647, %v411_v47  ;;  %v480_v56 = vld [vmem:[#allocation3] sm:$0xff]  ;;  %v482_v58 = vld [vmem:[#allocation3 + $0x10] sm:$0xff]  ;;  %v414_v59 = vsub.f32 %v406_v45, %v410_v46  ;;  %v416_v60 = vand.u32 2147483647, %v412_v50  ;;  %v215_v9 = vmul.f32 %v212_v52, %v212_v52 }
  0x41   :  { %v417_v61 = vand.u32 2147483647, %v413_v51  ;;  %v484_v63 = vld [vmem:[#allocation3 + $0x20] sm:$0xff]  ;;  %v485_v0 = vld [vmem:[#allocation3 + $0x28] sm:$0xff]  ;;  %v381_v1 = vsel %vm220_vm1, %v244_v11, 0.0  ;;  %v305_v2 = vadd.f32 %v304_v49, %v302_v43  ;;  %v486_v4 = vld [vmem:[#allocation3 + $0x30] sm:$0xff]  ;;  %v449_v14 = vadd.f32 %v448_v54, %v447_v44 }
  0x42   :  { %v217_v3 = vmul.f32 1.442695, %v213_v53  ;;  %v487_v5 = vld [vmem:[#allocation3 + $0x38] sm:$0xff]  ;;  %v488_v6 = vld [vmem:[#allocation3 + $0x40] sm:$0xff]  ;;  %v419_v7 = vadd.f32 %v416_v60, %v415_v55  ;;  %v214_v8 = vadd.f32 1.0, %v213_v53  ;;  %v489_v10 = vld [vmem:[#allocation3 + $0x48] sm:$0xff] }
  0x43   :  { %333 = vadd.xlane.f32.xlu2 %v332_v48  ;;  %v490_v12 = vld [vmem:[#allocation3 + $0x50] sm:$0xff]  ;;  %v491_v13 = vld [vmem:[#allocation3 + $0x58] sm:$0xff]  ;;  %v492_v15 = vld [vmem:[#allocation6] sm:$0xff]  ;;  %v418_v18 = vand.u32 2147483647, %v414_v59  ;;  %s1215_s23 = smov [#allocation21]  }
  0x44   :  { %753 = vpow2.f32 %v217_v3  ;;  %v493_v16 = vld [vmem:[#allocation6 + $0x8] sm:$0xff]  ;;  %v494_v17 = vld [vmem:[#allocation6 + $0x10] sm:$0xff]  ;;  %v495_v11 = vld [vmem:[#allocation6 + $0x18] sm:$0xff]  ;;  %v504_v21 = vsub.f32 %v480_v56, %v492_v15  ;;  %v420_v24 = vadd.f32 %v419_v7, %v417_v61  ;;  %v216_v31 = vsub.f32 %v214_v8, %v215_v9  ;;  %s1425_s1 = sshll.u32 %s1215_s23, 4  ;;  %s1216_s19 = smov [#allocation24]   ;;  %s596_s1 = int_to_ptr.vmem [resolvable:$true] %s1425_s1 }
  0x45   :  { %382 = vadd.xlane.f32.xlu0 %v381_v1  ;;  %v496_v19 = vld [vmem:[#allocation6 + $0x20] sm:$0xff]  ;;  %v497_v20 = vld [vmem:[#allocation6 + $0x28] sm:$0xff]  ;;  %v505_v22 = vsub.f32 %v481_v57, %v493_v16  ;;  %v506_v23 = vsub.f32 %v482_v58, %v494_v17  ;;  %v498_v25 = vld [vmem:[#allocation6 + $0x30] sm:$0xff]  ;;  %v507_v28 = vsub.f32 %v483_v62, %v495_v11  ;;  %s1429_s7 = sshll.u32 %s1216_s19, 4  ;;  %s619_s22 = sshll.u32 %s1521_s15, 4  ;;  %vm242_vm8 = vcmask 0   ;;  %s618_s7 = int_to_ptr.vmem [resolvable:$true] %s1429_s7  ;;  %s1439_s22 = int_to_ptr.hbm [resolvable:$true] %s619_s22 }
  0x46   :  { %v499_v26 = vld [vmem:[#allocation6 + $0x38] sm:$0xff]  ;;  %v500_v27 = vld [vmem:[#allocation6 + $0x40] sm:$0xff]  ;;  %v508_v29 = vsub.f32 %v484_v63, %v496_v19  ;;  %v509_v30 = vsub.f32 %v485_v0, %v497_v20  ;;  %v501_v32 = vld [vmem:[#allocation6 + $0x48] sm:$0xff]  ;;  %v510_v35 = vsub.f32 %v486_v4, %v498_v25  ;;  %v516_v41 = vand.u32 2147483647, %v504_v21  ;;  %s641_s26 = sshll.u32 %s1523_s17, 4  ;;  %s1443_s26 = int_to_ptr.hbm [resolvable:$true] %s641_s26 }
  0x47   :  { %306 = vadd.xlane.f32.xlu1 %v305_v2  ;;  %v502_v33 = vld [vmem:[#allocation6 + $0x50] sm:$0xff]  ;;  %v503_v34 = vld [vmem:[#allocation6 + $0x58] sm:$0xff]  ;;  %v511_v36 = vsub.f32 %v487_v5, %v499_v26  ;;  %v512_v37 = vsub.f32 %v488_v6, %v500_v27  ;;  %v513_v38 = vsub.f32 %v489_v10, %v501_v32  ;;  %v517_v42 = vand.u32 2147483647, %v505_v22  ;;  %s1217_s13 = smov [#allocation27]   ;;  %s1218_s8 = smov [#allocation20]  }
  0x48   :  { %v514_v39 = vsub.f32 %v490_v12, %v502_v33  ;;  %v515_v40 = vsub.f32 %v491_v13, %v503_v34  ;;  %v518_v43 = vand.u32 2147483647, %v506_v23  ;;  %v519_v44 = vand.u32 2147483647, %v507_v28  ;;  %s1441_s6 = sshll.u32 %s1217_s13, 4  ;;  %s1445_s28 = sshll.u32 %s1218_s8, 4 }
  0x49   :  { %v421_v46 = vadd.f32 %v420_v24, %v418_v18  ;;  %v520_v47 = vand.u32 2147483647, %v508_v29  ;;  %v521_v48 = vand.u32 2147483647, %v509_v30  ;;  %v522_v49 = vand.u32 2147483647, %v510_v35 }
  0x4a   :  { %v754_v45 = vpop.eup %753  ;;  %v523_v51 = vand.u32 2147483647, %v511_v36  ;;  %v524_v52 = vand.u32 2147483647, %v512_v37  ;;  %v525_v53 = vand.u32 2147483647, %v513_v38 }
  0x4b   :  { %450 = vadd.xlane.f32.xlu2 %v449_v14  ;;  %v219_v50 = vsub.f32 %v216_v31, %v754_v45  ;;  %v526_v54 = vand.u32 2147483647, %v514_v39  ;;  %v527_v55 = vand.u32 2147483647, %v515_v40  ;;  %v532_v56 = vadd.f32 %v520_v47, %v516_v41  ;;  %1537 = sst [smem:[#allocation40_spill]] %s1441_s6  ;;  %s586_s15 = sshll.u32 %s1518_s12, 4  ;;  %s1459_s15 = int_to_ptr.hbm [resolvable:$true] %s586_s15 }
  0x4c   :  { %v534_v57 = vadd.f32 %v521_v48, %v517_v42  ;;  %v536_v59 = vadd.f32 %v522_v49, %v518_v43  ;;  %v538_v60 = vadd.f32 %v523_v51, %v519_v44  ;;  %v1209_v4 = vmov 2.0   ;;  %1538 = sst [smem:[#allocation41_spill]] %s1445_s28  ;;  %s608_s17 = sshll.u32 %s1520_s14, 4  ;;  %s1461_s17 = int_to_ptr.hbm [resolvable:$true] %s608_s17 }
  0x4d   :  { %v221_v58 = vsel %vm220_vm1, %v219_v50, 0.0  ;;  %v533_v61 = vadd.f32 %v532_v56, %v524_v52  ;;  %755 = vrcp.f32 %v1209_v4  ;;  %v1210_v6 = vmov 256.0   ;;  %s1219_s10 = smov [#allocation23]   ;;  %s1220_s18 = smov [#allocation26]  }
  0x4e   :  { %222 = vadd.xlane.f32.xlu0 %v221_v58  ;;  %v535_v62 = vadd.f32 %v534_v57, %v525_v53  ;;  %v537_v63 = vadd.f32 %v536_v59, %v526_v54  ;;  %v539_v0 = vadd.f32 %v538_v60, %v527_v55  ;;  %757 = vrcp.f32 %v1210_v6  ;;  %s1454_s11 = sshll.u32 %s1219_s10, 4  ;;  %s1457_s5 = sshll.u32 %s1220_s18, 4 }
  0x4f   :  { %422 = vadd.xlane.f32.xlu1 %v421_v46  ;;  %v1211_v14 = vmov 2560.0   ;;  %v1212_v23 = vmov 4096.0   ;;  %v1213_v26 = vmov 2048.0   ;;  %v1214_v39 = vmov 12288.0   ;;  %1539 = sst [smem:[#allocation42_spill]] %s1454_s11  ;;  %s630_s3 = sshll.u32 %s1522_s16, 4  ;;  %s1470_s3 = int_to_ptr.hbm [resolvable:$true] %s630_s3 }
  0x50   :  { %v555_v1 = vadd.f32 %v535_v62, %v533_v61  ;;  %759 = vrcp.f32 %v1211_v14  ;;  %1540 = sst [smem:[#allocation43_spill]] %s1457_s5 }
  0x51   :  { %761 = vrcp.f32 %v1212_v23  ;;  %s1541_s29 = sld [smem:[#allocation47_spill]] }
  0x52   :  { %v556_v2 = vadd.f32 %v555_v1, %v537_v63  ;;  %763 = vrcp.f32 %v1213_v26 }
  0x53   :  { %v756_v8 = vpop.eup %755  ;;  %765 = vrcp.f32 %v1214_v39 }
  0x54   :  { %v557_v3 = vadd.f32 %v556_v2, %v539_v0  ;;  %v1384_v10 = vpop.eup %757  ;;  %v233_v12 = vmul.f32 2.0, %v756_v8  ;;  %vm237_vm2 = vweird.f32 %v756_v8 }
  0x55   :  { %v265_v15 = vmul.f32 256.0, %v1384_v10  ;;  %vm269_vm3 = vweird.f32 %v1384_v10 }
  0x56   :  { %558 = vadd.xlane.f32.xlu0 %v557_v3  ;;  %v234_v17 = vsub.f32 1.0, %v233_v12  ;;  %v1387_v20 = vpop.eup %759 }
  0x57   :  { %v266_v19 = vsub.f32 1.0, %v265_v15  ;;  %v316_v31 = vmul.f32 2560.0, %v1387_v20  ;;  %v1391_v40 = vpop.eup %761  ;;  %vm320_vm4 = vweird.f32 %v1387_v20  ;;  %s652_s10 = sshll.u32 %s1541_s29, 4  ;;  %s653_s10 = int_to_ptr.hbm [resolvable:$true] %s652_s10 }
  0x58   :  { %v235_v22 = vmul.f32 %v756_v8, %v234_v17  ;;  %v1394_v48 = vpop.eup %763  ;;  %v432_v55 = vmul.f32 4096.0, %v1391_v40  ;;  %vm436_vm5 = vweird.f32 %v1391_v40 }
  0x59   :  { %v267_v30 = vmul.f32 %v1384_v10, %v266_v19  ;;  %v317_v47 = vsub.f32 1.0, %v316_v31  ;;  %v1399_v59 = vpop.eup %765  ;;  %v460_v63 = vmul.f32 2048.0, %v1394_v48  ;;  %vm464_vm6 = vweird.f32 %v1394_v48 }
  0x5a   :  { %v236_v33 = vadd.f32 %v756_v8, %v235_v22  ;;  %v568_v14 = vmul.f32 12288.0, %v1399_v59  ;;  %vm572_vm7 = vweird.f32 %v1399_v59 }
  0x5b   :  { %v268_v46 = vadd.f32 %v1384_v10, %v267_v30  ;;  %v318_v62 = vmul.f32 %v1387_v20, %v317_v47 }
  0x5c   :  { %v238_v58 = vsel %vm237_vm2, %v756_v8, %v236_v33 }
  0x5d   :  { %v270_v2 = vsel %vm269_vm3, %v1384_v10, %v268_v46  ;;  %v319_v15 = vadd.f32 %v1387_v20, %v318_v62 }
  0xae   :  { %v361_v5 = vpop.xlane.xlu2 %360 }
  0xaf   :  { %v362_v27 = vrot.slane %v361_v5, 4 }
  0xb0   :  { %v256_v7 = vpop.xlane.xlu0 %255 }
  0xb1   :  { %v257_v18 = vrot.slane %v256_v7, 4  ;;  %v363_v44 = vadd.f32 %v362_v27, %v361_v5 }
  0xb2   :  { %v277_v9 = vpop.xlane.xlu1 %276 }
  0xb3   :  { %v278_v21 = vrot.slane %v277_v9, 4  ;;  %v258_v24 = vadd.f32 %v257_v18, %v256_v7  ;;  %v364_v60 = vrot.slane %v363_v44, 2  ;;  %v461_v18 = vsub.f32 1.0, %v460_v63 }
  0xb5   :  { %v279_v32 = vadd.f32 %v278_v21, %v277_v9  ;;  %v259_v34 = vrot.slane %v258_v24, 2  ;;  %v433_v9 = vsub.f32 1.0, %v432_v55  ;;  %v365_v17 = vadd.f32 %v364_v60, %v363_v44 }
  0xb6   :  { %v334_v13 = vpop.xlane.xlu2 %333  ;;  %v462_v30 = vmul.f32 %v1394_v48, %v461_v18 }
  0xb7   :  { %v335_v28 = vrot.slane %v334_v13, 4  ;;  %v280_v49 = vrot.slane %v279_v32, 2  ;;  %v260_v54 = vadd.f32 %v259_v34, %v258_v24  ;;  %v434_v24 = vmul.f32 %v1391_v40, %v433_v9 }
  0xb8   :  { %v383_v16 = vpop.xlane.xlu0 %382  ;;  %v366_v33 = vrot.slane %v365_v17, 1 }
  0xb9   :  { %v384_v35 = vrot.slane %v383_v16, 4  ;;  %v336_v45 = vadd.f32 %v335_v28, %v334_v13  ;;  %v281_v3 = vadd.f32 %v280_v49, %v279_v32  ;;  %v261_v6 = vrot.slane %v260_v54, 1 }
  0xba   :  { %v307_v11 = vpop.xlane.xlu1 %306  ;;  %v569_v28 = vsub.f32 1.0, %v568_v14 }
  0xbb   :  { %v308_v25 = vrot.slane %v307_v11, 4  ;;  %v385_v52 = vadd.f32 %v384_v35, %v383_v16  ;;  %v337_v61 = vrot.slane %v336_v45, 2  ;;  %v282_v10 = vrot.slane %v281_v3, 1 }
  0xbc   :  { %v262_v27 = vadd.f32 %v261_v6, %v260_v54 }
  0xbd   :  { %v309_v36 = vadd.f32 %v308_v25, %v307_v11  ;;  %v386_v4 = vrot.slane %v385_v52, 2  ;;  %v338_v16 = vadd.f32 %v337_v61, %v336_v45  ;;  %v283_v32 = vadd.f32 %v282_v10, %v281_v3 }
  0xbe   :  { %v451_v29 = vpop.xlane.xlu2 %450  ;;  %v463_v45 = vadd.f32 %v1394_v48, %v462_v30 }
  0xbf   :  { %v452_v41 = vrot.slane %v451_v29, 4  ;;  %v310_v53 = vrot.slane %v309_v36, 2  ;;  %v387_v23 = vadd.f32 %v386_v4, %v385_v52 }
  0xc1   :  { %v223_v38 = vpop.xlane.xlu0 %222  ;;  %v453_v56 = vadd.f32 %v452_v41, %v451_v29  ;;  %v311_v7 = vadd.f32 %v310_v53, %v309_v36  ;;  %v339_v29 = vrot.slane %v338_v16, 1  ;;  %v321_v36 = vsel %vm320_vm4, %v1387_v20, %v319_v15 }
  0xc2   :  { %v423_v37 = vpop.xlane.xlu1 %422  ;;  %v224_v43 = vrot.slane %v223_v38, 4  ;;  %v570_v41 = vmul.f32 %v1399_v59, %v569_v28 }
  0xc3   :  { %v424_v42 = vrot.slane %v423_v37, 4  ;;  %v454_v12 = vrot.slane %v453_v56, 2  ;;  %v312_v22 = vrot.slane %v311_v7, 1 }
  0xc4   :  { %v225_v51 = vadd.f32 %v224_v43, %v223_v38  ;;  %v435_v38 = vadd.f32 %v1391_v40, %v434_v24  ;;  %v367_v43 = vadd.f32 %v366_v33, %v365_v17 }
  0xc5   :  { %v425_v50 = vadd.f32 %v424_v42, %v423_v37  ;;  %v455_v25 = vadd.f32 %v454_v12, %v453_v56  ;;  %v313_v35 = vadd.f32 %v312_v22, %v311_v7  ;;  %v388_v37 = vrot.slane %v387_v23, 1 }
  0xc6   :  { %v226_v57 = vrot.slane %v225_v51, 2  ;;  %v340_v42 = vadd.f32 %v339_v29, %v338_v16  ;;  %v437_v20 = vsel %vm436_vm5, %v1391_v40, %v435_v38 }
  0xc7   :  { %v426_v0 = vrot.slane %v425_v50, 2  ;;  %v456_v39 = vrot.slane %v455_v25, 1  ;;  %v389_v47 = vadd.f32 %v388_v37, %v387_v23 }
  0xc8   :  { %v227_v1 = vadd.f32 %v226_v57, %v225_v51  ;;  %v465_v51 = vsel %vm464_vm6, %v1394_v48, %v463_v45 }
  0xc9   :  { %v559_v5 = vpop.xlane.xlu0 %558  ;;  %v427_v11 = vadd.f32 %v426_v0, %v425_v50  ;;  %v457_v49 = vadd.f32 %v456_v39, %v455_v25  ;;  %v571_v50 = vadd.f32 %v1399_v59, %v570_v41 }
  0xca   :  { %v560_v8 = vrot.slane %v559_v5, 4  ;;  %v228_v13 = vrot.slane %v227_v1, 1 }
  0xcb   :  { %v428_v34 = vrot.slane %v427_v11, 1  ;;  %v573_v53 = vsel %vm572_vm7, %v1399_v59, %v571_v50 }
  0xcc   :  { %v561_v19 = vadd.f32 %v560_v8, %v559_v5  ;;  %v229_v21 = vadd.f32 %v228_v13, %v227_v1 }
  0xcd   :  { %v429_v44 = vadd.f32 %v428_v34, %v427_v11 }
  0xce   :  { %v562_v26 = vrot.slane %v561_v19, 2  ;;  %694 = vpush %v229_v21 }
  0xcf   :  { %696 = vpush %v238_v58 }
  0xd0   :  { %v563_v31 = vadd.f32 %v562_v26, %v561_v19  ;;  %698 = vpush %v262_v27 }
  0xd1   :  { %700 = vpush %v270_v2 }
  0xd2   :  { %702 = vpush %v283_v32  ;;  %v564_v46 = vrot.slane %v563_v31, 1 }
  0xd3   :  { %704 = vpush %v313_v35 }
  0xd4   :  { %706 = vpush %v321_v36  ;;  %v565_v52 = vadd.f32 %v564_v46, %v563_v31 }
  0xd5   :  { %708 = vpush %v340_v42 }
  0xd6   :  { %710 = vpush %v367_v43 }
  0xd7   :  { %712 = vpush %v389_v47 }
  0xd8   :  { %714 = vpush %v429_v44 }
  0xd9   :  { %716 = vpush %v437_v20 }
  0xda   :  { %718 = vpush %v457_v49 }
  0xdb   :  { %720 = vpush %v465_v51 }
  0xdc   :  { %722 = vpush %v565_v52 }
  0xdd   :  { %724 = vpush %v573_v53 }
  0xff   :  { %s695_s14 = spop %694 }
 0x100   :  { %s231_s30 = smul.f32 -0.5, %s695_s14  ;;  %s1468_s23 = spop %696 }
 0x101   :  { %s699_s19 = spop %698 }
 0x102   :  { %s240_s9 = smul.f32 %s1468_s23, %s231_s30  ;;  %s701_s25 = spop %700 }
 0x103   :  { %s272_s2 = smul.f32 %s701_s25, %s699_s19  ;;  %s703_s24 = spop %702 }
 0x104   :  { %v241_v40 = vstv %s240_s9  ;;  %s293_s13 = smul.f32 %s703_s24, %s701_s25  ;;  %s705_s8 = spop %704 }
 0x105   :  { %s707_s4 = spop %706  ;;  %243 = vst.msk [vmem:[#allocation21] sm:$0x1] %vm242_vm8, %v241_v40 }
 0x106   :  { %s294_s16 = sadd.f32 %s293_s13, %s272_s2  ;;  %s323_s18 = smul.f32 %s707_s4, %s705_s8 }
 0x107   :  { %s709_s12 = spop %708 }
 0x108   :  { %s295_s20 = smul.f32 0.5, %s294_s16  ;;  %s711_s14 = spop %710 }
 0x109   :  { %s350_s30 = smul.f32 %s709_s12, %s707_s4  ;;  %s713_s5 = spop %712 }
 0x10a   :  { %v353_v48 = vstv %s295_s20  ;;  %s377_s19 = smul.f32 %s711_s14, %s707_s4  ;;  %s715_s11 = spop %714 }
 0x10b   :  { %s351_s9 = sadd.f32 %s350_s30, %s323_s18  ;;  %354 = vst.msk [vmem:[#allocation23] sm:$0x1] %vm242_vm8, %v353_v48  ;;  %s399_s24 = smul.f32 %s713_s5, %s701_s25 }
 0x10c   :  { %s378_s28 = ssub.f32 0.0, %s377_s19  ;;  %s717_s6 = spop %716 }
 0x10d   :  { %s352_s2 = smul.f32 0.5, %s351_s9  ;;  %s400_s13 = ssub.f32 0.0, %s399_s24 }
 0x10e   :  { %v379_v54 = vstv %s378_s28  ;;  %s439_s0 = smul.f32 %s717_s6, %s715_s11  ;;  %s719_s8 = spop %718 }
 0x10f   :  { %v355_v55 = vstv %s352_s2  ;;  %380 = vst.msk [vmem:[#allocation26] sm:$0x1] %vm242_vm8, %v379_v54  ;;  %v401_v56 = vstv %s400_s13  ;;  %s721_s4 = spop %720  ;;  %s1221_s16 = smov [#allocation29]  }
 0x110   :  { %s650_s27 = sshll.u32 %s1221_s16, 4  ;;  %s1542_s5 = sld [smem:[#allocation40_spill]]  ;;  %356 = vst.msk [vmem:[#allocation24] sm:$0x1] %vm242_vm8, %v355_v55  ;;  %s651_s27 = int_to_ptr.vmem [resolvable:$true] %s650_s27 }
 0x111   :  { %s467_s25 = smul.f32 %s721_s4, %s719_s8  ;;  %s1543_s6 = sld [smem:[#allocation41_spill]]  ;;  %402 = vst.msk [vmem:[#allocation27] sm:$0x1] %vm242_vm8, %v401_v56 }
 0x112   :  { %s723_s28 = spop %722  ;;  %s1544_s11 = sld [smem:[#allocation42_spill]] }
 0x113   :  { %s1545_s18 = sld [smem:[#allocation43_spill]]  ;;  %s725_s12 = spop %724 }
 0x114   :  { %s468_s30 = sadd.f32 %s467_s25, %s439_s0  ;;  %s575_s19 = smul.f32 %s725_s12, %s723_s28 }
 0x115   :  { %600 = dma.vmem_to_hbm [thread:$0]  %s596_s1, 16, %s1427_s21, [#allocation22]  }
 0x116   :  { %s477_s9 = smul.f32 %s1468_s23, %s468_s30  ;;  %v576_v57 = vstv %s575_s19  ;;  %s1546_s24 = int_to_ptr.vmem [resolvable:$true] %s1542_s5 }
 0x117   :  { %578 = vst.msk [vmem:[#allocation20] sm:$0x1] %vm242_vm8, %v576_v57  ;;  %622 = dma.vmem_to_hbm [thread:$0]  %s618_s7, 16, %s1439_s22, [#allocation25]  }
 0x118   :  { %v478_v58 = vstv %s477_s9  ;;  %644 = dma.vmem_to_hbm [thread:$0]  %s1546_s24, 16, %s1443_s26, [#allocation28]  }
 0x119   :  { %479 = vst.msk [vmem:[#allocation29] sm:$0x1] %vm242_vm8, %v478_v58  ;;  %s1547_s2 = int_to_ptr.vmem [resolvable:$true] %s1543_s6  ;;  %s1548_s29 = int_to_ptr.vmem [resolvable:$true] %s1544_s11 }
 0x11a   :  { %589 = dma.vmem_to_hbm [thread:$0]  %s1547_s2, 16, %s1459_s15, [#allocation5]  }
 0x11b   :  { %611 = dma.vmem_to_hbm [thread:$0]  %s1548_s29, 16, %s1461_s17, [#allocation22]  }
 0x11c   :  { %s1549_s13 = int_to_ptr.vmem [resolvable:$true] %s1545_s18 }
 0x11d   :  { %633 = dma.vmem_to_hbm [thread:$0]  %s1549_s13, 16, %s1470_s3, [#allocation25]  }
 0x11e   :  { %655 = dma.vmem_to_hbm [thread:$0]  %s651_s27, 16, %s653_s10, [#allocation28]  }
 0x11f   :  { %1187 = dma.done.wait [#allocation5], 16  }
 0x120   :  { %1188 = vsyncadd [#allocation5], 4294967280 }
 0x121   :  { %1189 = dma.done.wait [#allocation22], 32  }
 0x122   :  { %1190 = vsyncadd [#allocation22], 4294967264 }
 0x123   :  { %1191 = dma.done.wait [#allocation25], 32  }
 0x124   :  { %1192 = vsyncadd [#allocation25], 4294967264 }
 0x125   :  { %1193 = dma.done.wait [#allocation28], 32  }
 0x126   :  { %1194 = vsyncadd [#allocation28], 4294967264 }
 0x127   :  { %684 = vsyncpa [#allocation4], 1 }
 0x128   :  { %685 = vsyncpa [#allocation7], 1 }
 0x129   :  { %686 = vsyncpa [#allocation10], 1 }
 0x12a   :  { %687 = vsyncpa [#allocation13], 1 }
 0x12b   :  { %688 = vsyncpa [#allocation16], 1 }
 0x12c   :  { %689 = vsyncpa [#allocation19], 1 }
 0x12d   :  { %690 = vsyncpa [#allocation5], 1 }
 0x12e   :  { %691 = vsyncpa [#allocation22], 1 }
 0x12f   :  { %692 = vsyncpa [#allocation25], 1 }
 0x130   :  { %693 = vsyncpa [#allocation28], 1 }

</bundles_post_ra>
